<compile_context>
chip_gen: v7x
topology: tpu7x:2x2x1
jax: 0.10.0
libtpu: 0.0.40
codegen_flags: <defaults>
</compile_context>

<pallas_src>
import jax
import jax.numpy as jnp
from jax.experimental import pallas as pl
from jax.experimental.pallas import tpu as pltpu


# ----------------------------------------------------------------------------
# Kernels
# ----------------------------------------------------------------------------

def _interleave_kernel(x_ref, o_ref):
    """Channel interleave inside VMEM.

    x_ref: (nb, n_src, n_dst, hw)  -- contiguous input channels (src-major)
    o_ref: (nb, n_dst, n_src, hw)  -- contiguous output channels (dst-major)
    Relation: o[b, d, s, :] = x[b, s, d, :].
    Unrolled over the smaller channel factor; the last (lane) dim is untouched,
    so each statement is a plain (masked) sublane-strided copy.
    """
    _, n_src, n_dst, _ = x_ref.shape
    if n_src <= n_dst:
        for i in range(n_src):
            o_ref[:, :, i, :] = x_ref[:, i, :, :]
    else:
        for j in range(n_dst):
            o_ref[:, j, :, :] = x_ref[:, :, j, :]


def _copy_kernel(x_ref, o_ref):
    # Last-resort path: permutation lives in the index_map, body is a copy.
    o_ref[...] = x_ref[...]


# ----------------------------------------------------------------------------
# Block planning
# ----------------------------------------------------------------------------

def _divisors(n):
    return [d for d in range(1, n + 1) if n % d == 0]


def _choose_plan(N, g, cpg, hw, itemsize, budget_bytes, min_block_bytes,
                 target_steps):
    """Pick (nb, axis, chunk):
      nb    : images per block (divisor of N)
      axis  : "cpg" -> chunk the C/g factor (both DMAs fully contiguous)
              "g"   -> chunk the g factor (input contiguous, output strided)
      chunk : channels of that factor carried per block (divisor of the factor)
    Scoring: stay under the VMEM budget, prefer blocks >= min_block_bytes and
    >= target_steps grid steps (pipeline + megacore), then the largest block,
    then the fully-contiguous orientation, then channel-widening over
    batch-widening.
    """
    candidates = []
    for axis, extent, other, contig in (("cpg", cpg, g, 1), ("g", g, cpg, 0)):
        for nb in _divisors(N):
            for d in _divisors(extent):
                blk = nb * other * d * hw * itemsize
                if blk > budget_bytes:
                    continue
                steps = (N // nb) * (extent // d)
                meets_block = blk >= min_block_bytes
                meets_steps = steps >= target_steps
                key = (meets_block and meets_steps, meets_block, blk, contig, -nb)
                candidates.append((key, nb, axis, d))
    if not candidates:
        return None
    candidates.sort(key=lambda c: c[0])
    _, nb, axis, d = candidates[-1]
    return nb, axis, d


# ----------------------------------------------------------------------------
# Wrappers
# ----------------------------------------------------------------------------

def _channel_shuffle_per_plane(x, g, vmem_limit_bytes):
    """Last resort: per-channel (H, W) plane copy, permutation in the input
    index_map.  Only used when even a min(g, C/g)-channel slab overflows the
    VMEM budget (enormous spatial planes with tiny C)."""
    N, C, H, W = x.shape
    cpg = C // g
    itemsize = jnp.dtype(x.dtype).itemsize
    cost = pl.CostEstimate(flops=0, transcendentals=0,
                           bytes_accessed=2 * N * C * H * W * itemsize)
    in_spec = pl.BlockSpec(
        (None, None, H, W),
        lambda n, co: (n, (co % g) * cpg + co // g, 0, 0),
    )
    out_spec = pl.BlockSpec((None, None, H, W), lambda n, co: (n, co, 0, 0))
    return pl.pallas_call(
        _copy_kernel,
        out_shape=jax.ShapeDtypeStruct((N, C, H, W), x.dtype),
        grid_spec=pltpu.PrefetchScalarGridSpec(
            num_scalar_prefetch=0,
            grid=(N, C),
            in_specs=[in_spec],
            out_specs=out_spec,
        ),
        compiler_params=pltpu.CompilerParams(
            dimension_semantics=("parallel", "parallel"),
            vmem_limit_bytes=vmem_limit_bytes,
        ),
        cost_estimate=cost,
    )(x)


def channel_shuffle(x, groups, *,
                    block_budget_bytes=6 << 20,
                    min_block_bytes=512 << 10,
                    target_steps=8,
                    vmem_limit_bytes=32 << 20):
    """Pallas ChannelShuffle forward. x: (N, C, H, W), C % groups == 0."""
    N, C, H, W = x.shape
    g = int(groups)
    assert C % g == 0, f"Incompatible group size {g} for input channel {C}"
    cpg = C // g
    if g == 1 or cpg == 1:
        return x  # identity permutation

    hw = H * W
    itemsize = jnp.dtype(x.dtype).itemsize

    plan = _choose_plan(N, g, cpg, hw, itemsize, block_budget_bytes,
                        min_block_bytes, target_steps)
    if plan is None:
        return _channel_shuffle_per_plane(x, g, vmem_limit_bytes)
    nb, axis, chunk = plan

    cost = pl.CostEstimate(flops=0, transcendentals=0,
                           bytes_accessed=2 * N * C * hw * itemsize)
    cparams = pltpu.CompilerParams(
        dimension_semantics=("parallel", "parallel"),
        vmem_limit_bytes=vmem_limit_bytes,
    )

    if axis == "cpg":
        # Chunk along j (the C/g factor).  Input and output blocks are both
        # fully contiguous slabs; every block covers the full last-two dims.
        jd = chunk
        n_chunks = cpg // jd
        x5 = x.reshape(N, g, n_chunks, jd, hw)          # free view of NCHW
        in_spec = pl.BlockSpec(
            (nb, g, None, jd, hw), lambda b, c: (b, 0, c, 0, 0))
        out_spec = pl.BlockSpec(
            (nb, None, jd, g, hw), lambda b, c: (b, c, 0, 0, 0))
        out_shape = jax.ShapeDtypeStruct((N, n_chunks, jd, g, hw), x.dtype)
    else:
        # Chunk along i (the g factor).  Input blocks are contiguous; output
        # blocks are cpg coarse bursts of chunk*hw elements.
        id_ = chunk
        n_chunks = g // id_
        x5 = x.reshape(N, n_chunks, id_, cpg, hw)       # free view of NCHW
        in_spec = pl.BlockSpec(
            (nb, None, id_, cpg, hw), lambda b, c: (b, c, 0, 0, 0))
        out_spec = pl.BlockSpec(
            (nb, cpg, None, id_, hw), lambda b, c: (b, 0, c, 0, 0))
        out_shape = jax.ShapeDtypeStruct((N, cpg, n_chunks, id_, hw), x.dtype)

    out = pl.pallas_call(
        _interleave_kernel,
        out_shape=out_shape,
        grid_spec=pltpu.PrefetchScalarGridSpec(
            num_scalar_prefetch=0,
            grid=(N // nb, n_chunks),
            in_specs=[in_spec],
            out_specs=out_spec,
        ),
        compiler_params=cparams,
        cost_estimate=cost,
    )(x5)
    # Both 5-D output layouts flatten contiguously to channel index j*g + i.
    return out.reshape(N, C, H, W)


def channel_shuffle_ref(x, groups):
    """Pure-JAX reference matching the PyTorch forward exactly."""
    N, C, H, W = x.shape
    g = groups
    return (
        x.reshape(N, g, C // g, H, W)
        .transpose(0, 2, 1, 3, 4)
        .reshape(N, C, H, W)
    )


if __name__ == "__main__":
    key = jax.random.PRNGKey(0)

    # Headline shape first (NCHW, small), then cases that exercise every code
    # path: both channel orientations, non-multiple-of-128 spatial sizes
    # (the common ShuffleNet regime), forced channel chunking along each axis,
    # and the last-resort per-plane fallback.
    configs = [
        ((2, 4, 16, 16), 2, {}),                              # g == cpg == 2
        ((2, 8, 16, 16), 2, {}),                              # cpg > g
        ((2, 8, 16, 16), 4, {}),                              # g > cpg
        ((2, 8, 14, 14), 4, {}),                              # hw % 128 != 0
        ((2, 6, 7, 9), 3, {}),                                # odd everything
        ((1, 32, 4, 4), 8, dict(block_budget_bytes=1200)),    # cpg-axis chunking
        ((1, 32, 4, 4), 16, dict(block_budget_bytes=512)),    # g-axis chunking
        ((2, 4, 16, 16), 2, dict(block_budget_bytes=64)),     # per-plane fallback
    ]

    for shape, groups, kw in configs:
        key, sub = jax.random.split(key)
        x = jax.random.normal(sub, shape, dtype=jnp.float32)

        out = channel_shuffle(x, groups, **kw)
        out = jax.block_until_ready(out)

        ref = channel_shuffle_ref(x, groups)
        assert out.shape == ref.shape and out.dtype == ref.dtype
        assert jnp.array_equal(out, ref), (
            f"Pallas channel shuffle mismatch vs reference for {shape}, "
            f"g={groups}, opts={kw}"
        )

    print("KERNEL_OK")
</pallas_src>

<mosaic_0001>
module attributes {stable_mosaic.version = 11 : i64} {
  func.func @_interleave_kernel(%arg0: i32, %arg1: i32, %arg2: memref<2x2x1x2x256xf32, #tpu.memory_space<vmem>>, %arg3: memref<2x1x2x2x256xf32, #tpu.memory_space<vmem>>) attributes {dimension_semantics = [#tpu.dimension_semantics<parallel>, #tpu.dimension_semantics<parallel>], iteration_bounds = array<i64: 1, 1>, scalar_prefetch = 0 : i64, scratch_operands = 0 : i64, tpu.core_type = #tpu.core_type<tc>, window_params = [{transform_indices = @transform_0, window_bounds = array<i64: 2, 2, 1, 2, 256>}, {transform_indices = @transform_1, window_bounds = array<i64: 2, 1, 2, 2, 256>}]} {
    %c0 = arith.constant 0 : index
    %c0_0 = arith.constant 0 : index
    %c0_1 = arith.constant 0 : index
    %c0_2 = arith.constant 0 : index
    %c0_3 = arith.constant 0 : index
    %0 = vector.load %arg2[%c0, %c0_0, %c0_1, %c0_2, %c0_3] : memref<2x2x1x2x256xf32, #tpu.memory_space<vmem>>, vector<2x1x1x2x256xf32>
    %1 = vector.shape_cast %0 : vector<2x1x1x2x256xf32> to vector<2x2x256xf32>
    %c0_4 = arith.constant 0 : index
    %c0_5 = arith.constant 0 : index
    %c0_6 = arith.constant 0 : index
    %c0_7 = arith.constant 0 : index
    %c0_8 = arith.constant 0 : index
    %2 = vector.load %arg3[%c0_4, %c0_5, %c0_6, %c0_7, %c0_8] : memref<2x1x2x2x256xf32, #tpu.memory_space<vmem>>, vector<2x1x2x1x256xf32>
    %3 = vector.shape_cast %2 : vector<2x1x2x1x256xf32> to vector<2x2x256xf32>
    %4 = vector.shape_cast %1 : vector<2x2x256xf32> to vector<2x1x2x1x256xf32>
    tpu.vector_store %arg3[%c0_4, %c0_5, %c0_6, %c0_7, %c0_8], %4 {strides = array<i32>} : memref<2x1x2x2x256xf32, #tpu.memory_space<vmem>>, vector<2x1x2x1x256xf32>,
    %c0_9 = arith.constant 0 : index
    %c1 = arith.constant 1 : index
    %c0_10 = arith.constant 0 : index
    %c0_11 = arith.constant 0 : index
    %c0_12 = arith.constant 0 : index
    %5 = vector.load %arg2[%c0_9, %c1, %c0_10, %c0_11, %c0_12] : memref<2x2x1x2x256xf32, #tpu.memory_space<vmem>>, vector<2x1x1x2x256xf32>
    %6 = vector.shape_cast %5 : vector<2x1x1x2x256xf32> to vector<2x2x256xf32>
    %c0_13 = arith.constant 0 : index
    %c0_14 = arith.constant 0 : index
    %c0_15 = arith.constant 0 : index
    %c1_16 = arith.constant 1 : index
    %c0_17 = arith.constant 0 : index
    %7 = vector.load %arg3[%c0_13, %c0_14, %c0_15, %c1_16, %c0_17] : memref<2x1x2x2x256xf32, #tpu.memory_space<vmem>>, vector<2x1x2x1x256xf32>
    %8 = vector.shape_cast %7 : vector<2x1x2x1x256xf32> to vector<2x2x256xf32>
    %9 = vector.shape_cast %6 : vector<2x2x256xf32> to vector<2x1x2x1x256xf32>
    tpu.vector_store %arg3[%c0_13, %c0_14, %c0_15, %c1_16, %c0_17], %9 {strides = array<i32>} : memref<2x1x2x2x256xf32, #tpu.memory_space<vmem>>, vector<2x1x2x1x256xf32>,
    return
  }
  func.func @transform_0(%arg0: i32, %arg1: i32) -> (i32, i32, i32, i32, i32) {
    %c0_i32 = arith.constant 0 : i32
    %c0_i32_0 = arith.constant 0 : i32
    %c0_i32_1 = arith.constant 0 : i32
    %c0_i32_2 = arith.constant 0 : i32
    return %arg0, %c0_i32, %arg1, %c0_i32_0, %c0_i32_1 : i32, i32, i32, i32, i32
  }
  func.func @transform_1(%arg0: i32, %arg1: i32) -> (i32, i32, i32, i32, i32) {
    %c0_i32 = arith.constant 0 : i32
    %c0_i32_0 = arith.constant 0 : i32
    %c0_i32_1 = arith.constant 0 : i32
    %c0_i32_2 = arith.constant 0 : i32
    return %arg0, %arg1, %c0_i32, %c0_i32_0, %c0_i32_1 : i32, i32, i32, i32, i32
  }
}

</mosaic_0001>

<bundles_post_ra>
// kernel: tpu_custom_call.1
= control target key start
LH: loop header
LB: loop body
LE: loop exit
PB: predicated region body
PF: predicated region fallthrough
CT: control target
= control target key end

     0   :  { %6 = vsyncpa [#allocation3], 0  ;;  %s228_s0 = inlined_call_operand.hbm [shape: f32[2,2,1,2,256], index: 0, kind: input, shape index: {}]   ;;  %s229_s1 = inlined_call_operand.hbm [shape: f32[2,1,2,2,256], index: 1, kind: output, shape index: {}]  }
   0x1   :  { %7 = vsyncpa [#allocation4], 0  ;;  %s164_s6 = smov [#allocation2]   ;;  %s116_s10 = scalar_lea.hbm %s228_s0, 256 }
   0x2   :  { %s13_s7 = sshll.u32 %s164_s6, 4  ;;  %p117_p0 = scmp.ne.s32.totalorder %s228_s0, %s116_s10  ;;  %s14_s7 = int_to_ptr.vmem [resolvable:$true] %s13_s7 }
   0x3   :  { %p120_p1 = scmp.lt.u32.totalorder %s116_s10, %s228_s0 }
   0x5   :  { %p122_p2 = pnand %p120_p1, %p117_p0 }
   0x7   :  { %125 = shalt.err (!%p122_p2)
}
   0x8   :  { %s126_s15 = scalar_lea.vmem %s14_s7, 256  ;;  %p131_p4 = scmp.lt.s32.totalorder %s14_s7, %s14_s7 }
   0x9   :  { %p127_p3 = scmp.ne.s32.totalorder %s14_s7, %s126_s15  ;;  %p132_p5 = scmp.lt.s32.totalorder %s126_s15, %s126_s15 }
   0xb   :  { %p133_p6 = por %p132_p5, %p131_p4 }
   0xd   :  { %p134_p7 = pnand %p133_p6, %p127_p3 }
   0xf   :  { %137 = shalt.err (!%p134_p7)
}
  0x10   :  { %s165_s16 = smov 64   ;;  %s166_s17 = smov 4  }
  0x11   :  { %19 = dma.hbm_to_vmem [thread:$0]  %s228_s0, 256, %s14_s7, [#allocation3], %s165_s16, %s165_s16, %s166_s17  }
  0x12   :  { %160 = dma.done.wait [#allocation3], 256  }
  0x13   :  { %161 = vsyncadd [#allocation3], 4294967040  ;;  %v47_v0 = vlaneseq  ;;  %v108_v2 = vld.sshfl [vmem:[#allocation2] sm:$0x33 pattern:$0x75316420] }
  0x14   :  { %v34_v3 = vcombine.high %v108_v2, %v108_v2  ;;  %v109_v4 = vld.sshfl [vmem:[#allocation2 + $0x8] sm:$0x33 pattern:$0x75316420]  ;;  %s167_s20 = smov [#allocation5]  }
  0x15   :  { %vm193_vm0 = vcmp.lt.s32.totalorder %v47_v0, 256  ;;  %s96_s21 = sshll.u32 %s167_s20, 4  ;;  %v42_v5 = vcombine.high %v109_v4, %v109_v4  ;;  %v110_v6 = vld.sshfl [vmem:[#allocation2 + $0x4] sm:$0x33 pattern:$0x75316420]  ;;  %s97_s21 = int_to_ptr.vmem [resolvable:$true] %s96_s21 }
  0x16   :  { %51 = vst.msk [vmem:[#allocation5] ss:$2 sm:$0x3] %vm193_vm0, %v108_v2  ;;  %55 = vst.msk [vmem:[#allocation5 + $0x8] ss:$2 sm:$0x3] %vm193_vm0, %v109_v4  ;;  %v70_v7 = vcombine.high %v110_v6, %v110_v6  ;;  %p143_p9 = scmp.lt.s32.totalorder %s97_s21, %s97_s21 }
  0x17   :  { %53 = vst.msk [vmem:[#allocation5 + $0x4] ss:$2 sm:$0x3] %vm193_vm0, %v34_v3  ;;  %84 = vst.msk [vmem:[#allocation5 + $0x1] ss:$2 sm:$0x3] %vm193_vm0, %v110_v6 }
  0x18   :  { %v111_v8 = vld.sshfl [vmem:[#allocation2 + $0xc] sm:$0x33 pattern:$0x75316420]  ;;  %s138_s0 = scalar_lea.vmem %s97_s21, 256 }
  0x19   :  { %57 = vst.msk [vmem:[#allocation5 + $0xc] ss:$2 sm:$0x3] %vm193_vm0, %v42_v5  ;;  %v78_v9 = vcombine.high %v111_v8, %v111_v8  ;;  %88 = vst.msk [vmem:[#allocation5 + $0x9] ss:$2 sm:$0x3] %vm193_vm0, %v111_v8  ;;  %p139_p8 = scmp.ne.s32.totalorder %s97_s21, %s138_s0  ;;  %p144_p10 = scmp.lt.s32.totalorder %s138_s0, %s138_s0 }
  0x1a   :  { %86 = vst.msk [vmem:[#allocation5 + $0x5] ss:$2 sm:$0x3] %vm193_vm0, %v70_v7 }
  0x1b   :  { %90 = vst.msk [vmem:[#allocation5 + $0xd] ss:$2 sm:$0x3] %vm193_vm0, %v78_v9  ;;  %p145_p11 = por %p144_p10, %p143_p9 }
  0x1d   :  { %p146_p12 = pnand %p145_p11, %p139_p8 }
  0x1f   :  { %149 = shalt.err (!%p146_p12)
}
  0x20   :  { %s150_s24 = scalar_lea.hbm %s229_s1, 256 }
  0x21   :  { %p151_p13 = scmp.ne.s32.totalorder %s229_s1, %s150_s24  ;;  %p154_p0 = scmp.lt.u32.totalorder %s150_s24, %s229_s1 }
  0x23   :  { %p156_p1 = pnand %p154_p0, %p151_p13 }
  0x25   :  { %159 = shalt.err (!%p156_p1)
}
  0x26   :  { %102 = dma.vmem_to_hbm [thread:$0]  %s97_s21, 256, %s229_s1, [#allocation4], %s165_s16, %s165_s16, %s166_s17  }
  0x27   :  { %162 = dma.done.wait [#allocation4], 256  }
  0x28   :  { %163 = vsyncadd [#allocation4], 4294967040 }
  0x29   :  { %106 = vsyncpa [#allocation3], 1 }
  0x2a   :  { %107 = vsyncpa [#allocation4], 1 }

</bundles_post_ra>
